<compile_context>
chip_gen: v7x
topology: tpu7x:2x2x1
jax: 0.10.0
libtpu: 0.0.40
codegen_flags: <defaults>
</compile_context>

<pallas_src>
import jax
import jax.numpy as jnp
from jax.experimental import pallas as pl
from jax.experimental.pallas import tpu as pltpu


def _round_up(x, m):
    return ((x + m - 1) // m) * m


def _encoder_kernel(x_ref, w1_ref, b1_ref, w2_ref, b2_ref, o_ref):
    # x_ref:  (tile_m, patch_dim)   compute dtype (f32 or bf16)
    # w1_ref: (patch_dim, dmp)      compute dtype   (rows permuted to (c l) order)
    # b1_ref: (1, dmp)              f32
    # w2_ref: (dmp, dmp)            compute dtype
    # b2_ref: (1, dmp)              f32
    # o_ref:  (tile_m, dmp)
    h = jnp.dot(x_ref[...], w1_ref[...], preferred_element_type=jnp.float32)
    h = jnp.maximum(h + b1_ref[...], 0.0)          # bias + ReLU in f32
    h = h.astype(w2_ref.dtype)                     # bf16 feed iff weights are bf16
    out = jnp.dot(h, w2_ref[...], preferred_element_type=jnp.float32)
    o_ref[...] = (out + b2_ref[...]).astype(o_ref.dtype)


def patch_encoder_forward(x, params, *, trace_id=0, patch_len=16,
                          tile_m=512, compute_dtype=None):
    """Forward pass of LinearPatchEncoder2.

    x: [B, T, C, seq] (ndim==4 -> x[:, trace_id])
       or [B, S, T, C, seq] (ndim==5 -> x[:, :, trace_id]).
    Returns [B, (S,), n_patches, d_model].
    """
    w1, b1, w2, b2 = params
    patch_dim, d_model = w1.shape

    trace = x[:, :, trace_id] if x.ndim == 5 else x[:, trace_id]
    lead = trace.shape[:-2]
    C, seq = trace.shape[-2], trace.shape[-1]
    L = patch_len
    assert seq % L == 0, f"seq ({seq}) must be divisible by patch_len ({L})"
    N = seq // L
    assert patch_dim == L * C, (patch_dim, L, C)

    # ---- activation prep: (lead, C, N, L) -> (lead, N, C, L) ----------------
    # Cheap non-minor transpose (C <-> N); minor dim keeps contiguous L runs.
    # The matching '(l c) -> (c l)' reorder is applied to W1's rows (below),
    # so the composite is exactly the einops 'c (n l) -> n (l c)' + Linear.
    t = trace.reshape(lead + (C, N, L))
    nl = len(lead)
    perm = tuple(range(nl)) + (nl + 1, nl, nl + 2)
    patches = jnp.transpose(t, perm).reshape(lead + (N, patch_dim))

    rows = 1
    for d in lead + (N,):
        rows *= d
    x2d = patches.reshape(rows, patch_dim)

    # ---- weight-row permutation: feature order (l c) -> (c l) ---------------
    # w1_perm[c*L + l, :] == w1[l*C + c, :]; done once on a tiny array.
    w1 = w1.reshape(L, C, d_model).transpose(1, 0, 2).reshape(L * C, d_model)

    # ---- lane-dense output: pad d_model (weights only) to a multiple of 128 -
    dmp = _round_up(d_model, 128)
    pad_d = dmp - d_model
    if pad_d:
        w1 = jnp.pad(w1, ((0, 0), (0, pad_d)))
        w2 = jnp.pad(w2, ((0, pad_d), (0, pad_d)))
        b1 = jnp.pad(b1, (0, pad_d))
        b2 = jnp.pad(b2, (0, pad_d))
    b1r = b1.reshape(1, dmp).astype(jnp.float32)
    b2r = b2.reshape(1, dmp).astype(jnp.float32)

    # ---- optional bf16 data movement (accumulation stays f32 in the kernel) -
    if compute_dtype is not None:
        x2d = x2d.astype(compute_dtype)
        w1 = w1.astype(compute_dtype)
        w2 = w2.astype(compute_dtype)

    # ---- row tiling: big tiles; ragged tail masked by Pallas (no jnp.pad) ---
    tile_m = max(8, min(tile_m, _round_up(rows, 8)))
    if rows >= 512 and pl.cdiv(rows, tile_m) == 1:
        # Split so both v7x TensorCores get work (harmless on v5e/v6e).
        tile_m = max(256, _round_up(pl.cdiv(rows, 2), 8))
    grid = (pl.cdiv(rows, tile_m),)

    in_itm = x2d.dtype.itemsize
    out_dtype = x.dtype
    out_itm = jnp.dtype(out_dtype).itemsize

    flops = 2 * rows * patch_dim * dmp + 2 * rows * dmp * dmp
    bytes_accessed = (rows * patch_dim * in_itm
                      + (patch_dim * dmp + dmp * dmp) * in_itm
                      + 2 * dmp * 4
                      + rows * dmp * out_itm)

    # Double-buffered VMEM footprint (+ the f32 intermediate staged in VMEM).
    vmem_need = 2 * ((tile_m * patch_dim + tile_m * dmp) * in_itm
                     + (patch_dim * dmp + dmp * dmp) * in_itm
                     + 2 * dmp * 4
                     + tile_m * dmp * 4)
    vmem_limit = min(64 * 1024 * 1024, max(32 * 1024 * 1024, 2 * vmem_need))

    out2d = pl.pallas_call(
        _encoder_kernel,
        out_shape=jax.ShapeDtypeStruct((rows, dmp), out_dtype),
        grid=grid,
        in_specs=[
            pl.BlockSpec((tile_m, patch_dim), lambda i: (i, 0)),
            pl.BlockSpec((patch_dim, dmp), lambda i: (0, 0)),
            pl.BlockSpec((1, dmp), lambda i: (0, 0)),
            pl.BlockSpec((dmp, dmp), lambda i: (0, 0)),
            pl.BlockSpec((1, dmp), lambda i: (0, 0)),
        ],
        out_specs=pl.BlockSpec((tile_m, dmp), lambda i: (i, 0)),
        compiler_params=pltpu.CompilerParams(
            dimension_semantics=("parallel",),
            vmem_limit_bytes=vmem_limit),
        cost_estimate=pl.CostEstimate(
            flops=flops, transcendentals=0, bytes_accessed=bytes_accessed),
    )(x2d, w1, b1r, w2, b2r)

    out = out2d.reshape(lead + (N, dmp))
    if pad_d:
        out = out[..., :d_model]
    return out


def init_params(key, patch_dim, d_model, dtype=jnp.float32):
    # nn.Linear-style init: uniform(-1/sqrt(fan_in), 1/sqrt(fan_in)),
    # weights stored as (in_features, out_features).
    k1, k2, k3, k4 = jax.random.split(key, 4)
    lim1 = 1.0 / (patch_dim ** 0.5)
    lim2 = 1.0 / (d_model ** 0.5)
    w1 = jax.random.uniform(k1, (patch_dim, d_model), dtype, -lim1, lim1)
    b1 = jax.random.uniform(k2, (d_model,), dtype, -lim1, lim1)
    w2 = jax.random.uniform(k3, (d_model, d_model), dtype, -lim2, lim2)
    b2 = jax.random.uniform(k4, (d_model,), dtype, -lim2, lim2)
    return w1, b1, w2, b2


def _reference(x, params, *, trace_id=0, patch_len=16):
    # Pure-JAX reference of the PyTorch forward (einops '(l c)' ordering).
    w1, b1, w2, b2 = params
    trace = x[:, :, trace_id] if x.ndim == 5 else x[:, trace_id]
    lead = trace.shape[:-2]
    C, seq = trace.shape[-2], trace.shape[-1]
    L = patch_len
    N = seq // L
    t = trace.reshape(lead + (C, N, L))
    perm = tuple(range(len(lead))) + (len(lead) + 1, len(lead) + 2, len(lead))
    patches = jnp.transpose(t, perm).reshape(lead + (N, L * C))
    h = jnp.maximum(patches @ w1 + b1, 0.0)
    return h @ w2 + b2


if __name__ == "__main__":
    # Small shapes consistent with the module (d_model matches the default 128):
    B, T, C = 2, 3, 4
    patch_len, n_patches, d_model = 16, 8, 128
    seq = patch_len * n_patches
    trace_id = 1

    key = jax.random.PRNGKey(0)
    kx, kp, kx5 = jax.random.split(key, 3)
    params = init_params(kp, patch_len * C, d_model)

    # 4-D input: [B, T, C, seq]
    x = jax.random.normal(kx, (B, T, C, seq), dtype=jnp.float32)
    out = jax.block_until_ready(
        patch_encoder_forward(x, params, trace_id=trace_id, patch_len=patch_len))
    ref = _reference(x, params, trace_id=trace_id, patch_len=patch_len)
    assert out.shape == (B, n_patches, d_model), out.shape
    assert jnp.allclose(out, ref, atol=1e-4, rtol=1e-4)

    # 5-D input: [B, S, T, C, seq]; also exercises the ragged-last-tile path
    # (rows = 2*3*8 = 48 with tile_m=32 -> grid of 2, last tile masked).
    S = 3
    x5 = jax.random.normal(kx5, (B, S, T, C, seq), dtype=jnp.float32)
    out5 = jax.block_until_ready(
        patch_encoder_forward(x5, params, trace_id=trace_id,
                              patch_len=patch_len, tile_m=32))
    ref5 = _reference(x5, params, trace_id=trace_id, patch_len=patch_len)
    assert out5.shape == (B, S, n_patches, d_model), out5.shape
    assert jnp.allclose(out5, ref5, atol=1e-4, rtol=1e-4)

    print("KERNEL_OK")
</pallas_src>

<mosaic_0001>
module attributes {stable_mosaic.version = 11 : i64} {
  func.func @_encoder_kernel(%arg0: i32, %arg1: memref<16x64xf32, #tpu.memory_space<vmem>>, %arg2: memref<64x128xf32, #tpu.memory_space<vmem>>, %arg3: memref<1x128xf32, #tpu.memory_space<vmem>>, %arg4: memref<128x128xf32, #tpu.memory_space<vmem>>, %arg5: memref<1x128xf32, #tpu.memory_space<vmem>>, %arg6: memref<16x128xf32, #tpu.memory_space<vmem>>) attributes {dimension_semantics = [#tpu.dimension_semantics<parallel>], iteration_bounds = array<i64: 1>, scalar_prefetch = 0 : i64, scratch_operands = 0 : i64, tpu.core_type = #tpu.core_type<tc>, window_params = [{transform_indices = @transform_0, window_bounds = array<i64: 16, 64>}, {pipeline_mode = #tpu.pipeline_mode<synchronous>, transform_indices = @transform_1, window_bounds = array<i64: 64, 128>}, {pipeline_mode = #tpu.pipeline_mode<synchronous>, transform_indices = @transform_2, window_bounds = array<i64: 1, 128>}, {pipeline_mode = #tpu.pipeline_mode<synchronous>, transform_indices = @transform_3, window_bounds = array<i64: 128, 128>}, {pipeline_mode = #tpu.pipeline_mode<synchronous>, transform_indices = @transform_4, window_bounds = array<i64: 1, 128>}, {transform_indices = @transform_5, window_bounds = array<i64: 16, 128>}]} {
    %c0 = arith.constant 0 : index
    %c0_0 = arith.constant 0 : index
    %0 = vector.load %arg1[%c0, %c0_0] : memref<16x64xf32, #tpu.memory_space<vmem>>, vector<16x64xf32>
    %c0_1 = arith.constant 0 : index
    %c0_2 = arith.constant 0 : index
    %1 = vector.load %arg2[%c0_1, %c0_2] : memref<64x128xf32, #tpu.memory_space<vmem>>, vector<64x128xf32>
    %cst = arith.constant dense<0.000000e+00> : vector<16x128xf32>
    %2 = tpu.matmul %0, %1, %cst {dimension_numbers = #tpu.dot_dimension_numbers<[1], [0], [0], [1], [0, 0, 1, 1], [], []>} : vector<16x64xf32>, vector<64x128xf32>, vector<16x128xf32> -> vector<16x128xf32>
    %c0_3 = arith.constant 0 : index
    %c0_4 = arith.constant 0 : index
    %3 = vector.load %arg3[%c0_3, %c0_4] : memref<1x128xf32, #tpu.memory_space<vmem>>, vector<1x128xf32>
    %4 = vector.broadcast %3 : vector<1x128xf32> to vector<16x128xf32>
    %5 = arith.addf %2, %4 : vector<16x128xf32>
    %cst_5 = arith.constant 0.000000e+00 : f32
    %6 = vector.broadcast %cst_5 : f32 to vector<16x128xf32>
    %7 = arith.maximumf %5, %6 : vector<16x128xf32>
    %c0_6 = arith.constant 0 : index
    %c0_7 = arith.constant 0 : index
    %8 = vector.load %arg4[%c0_6, %c0_7] : memref<128x128xf32, #tpu.memory_space<vmem>>, vector<128x128xf32>
    %cst_8 = arith.constant dense<0.000000e+00> : vector<16x128xf32>
    %9 = tpu.matmul %7, %8, %cst_8 {dimension_numbers = #tpu.dot_dimension_numbers<[1], [0], [0], [1], [0, 0, 1, 1], [], []>} : vector<16x128xf32>, vector<128x128xf32>, vector<16x128xf32> -> vector<16x128xf32>
    %c0_9 = arith.constant 0 : index
    %c0_10 = arith.constant 0 : index
    %10 = vector.load %arg5[%c0_9, %c0_10] : memref<1x128xf32, #tpu.memory_space<vmem>>, vector<1x128xf32>
    %11 = vector.broadcast %10 : vector<1x128xf32> to vector<16x128xf32>
    %12 = arith.addf %9, %11 : vector<16x128xf32>
    %c0_11 = arith.constant 0 : index
    %c0_12 = arith.constant 0 : index
    %13 = vector.load %arg6[%c0_11, %c0_12] : memref<16x128xf32, #tpu.memory_space<vmem>>, vector<16x128xf32>
    tpu.vector_store %arg6[%c0_11, %c0_12], %12 {strides = array<i32>} : memref<16x128xf32, #tpu.memory_space<vmem>>, vector<16x128xf32>,
    return
  }
  func.func @transform_0(%arg0: i32) -> (i32, i32) {
    %c0_i32 = arith.constant 0 : i32
    %c0_i32_0 = arith.constant 0 : i32
    return %arg0, %c0_i32 : i32, i32
  }
  func.func @transform_1(%arg0: i32) -> (i32, i32) {
    %c0_i32 = arith.constant 0 : i32
    %c0_i32_0 = arith.constant 0 : i32
    %c0_i32_1 = arith.constant 0 : i32
    return %c0_i32, %c0_i32_0 : i32, i32
  }
  func.func @transform_2(%arg0: i32) -> (i32, i32) {
    %c0_i32 = arith.constant 0 : i32
    %c0_i32_0 = arith.constant 0 : i32
    %c0_i32_1 = arith.constant 0 : i32
    return %c0_i32, %c0_i32_0 : i32, i32
  }
  func.func @transform_3(%arg0: i32) -> (i32, i32) {
    %c0_i32 = arith.constant 0 : i32
    %c0_i32_0 = arith.constant 0 : i32
    %c0_i32_1 = arith.constant 0 : i32
    return %c0_i32, %c0_i32_0 : i32, i32
  }
  func.func @transform_4(%arg0: i32) -> (i32, i32) {
    %c0_i32 = arith.constant 0 : i32
    %c0_i32_0 = arith.constant 0 : i32
    %c0_i32_1 = arith.constant 0 : i32
    return %c0_i32, %c0_i32_0 : i32, i32
  }
  func.func @transform_5(%arg0: i32) -> (i32, i32) {
    %c0_i32 = arith.constant 0 : i32
    %c0_i32_0 = arith.constant 0 : i32
    return %arg0, %c0_i32 : i32, i32
  }
}

</mosaic_0001>

<bundles_post_ra>
// kernel: tpu_custom_call.1
= control target key start
LH: loop header
LB: loop body
LE: loop exit
PB: predicated region body
PF: predicated region fallthrough
CT: control target
= control target key end

     0   :  { %10 = vsyncpa [#allocation3], 0  ;;  %s626_s0 = inlined_call_operand.hbm [shape: f32[16,64], index: 0, kind: input, shape index: {}]   ;;  %s627_s1 = inlined_call_operand.hbm [shape: f32[64,128], index: 1, kind: input, shape index: {}]   ;;  %s628_s2 = inlined_call_operand.vmem [shape: f32[1,128], index: 2, kind: input, shape index: {}]   ;;  %s629_s3 = inlined_call_operand.hbm [shape: f32[128,128], index: 3, kind: input, shape index: {}]   ;;  %s630_s4 = inlined_call_operand.vmem [shape: f32[1,128], index: 4, kind: input, shape index: {}]   ;;  %s631_s5 = inlined_call_operand.hbm [shape: f32[16,128], index: 5, kind: output, shape index: {}]  }
   0x1   :  { %11 = vsyncpa [#allocation6], 0 }
   0x2   :  { %12 = vsyncpa [#allocation4], 0  ;;  %s515_s18 = smov [#allocation5]   ;;  %s516_s20 = smov [#allocation2]  }
   0x3   :  { %s30_s19 = sshll.u32 %s515_s18, 4  ;;  %s18_s21 = sshll.u32 %s516_s20, 4  ;;  %s31_s19 = int_to_ptr.vmem [resolvable:$true] %s30_s19  ;;  %s551_s21 = int_to_ptr.vmem [resolvable:$true] %s18_s21 }
   0x4   :  { %s421_s24 = scalar_lea.hbm %s627_s1, 1024 }
   0x5   :  { %p422_p0 = scmp.ne.s32.totalorder %s627_s1, %s421_s24  ;;  %p425_p1 = scmp.lt.u32.totalorder %s421_s24, %s627_s1 }
   0x7   :  { %p427_p2 = pnand %p425_p1, %p422_p0 }
   0x9   :  { %430 = shalt.err (!%p427_p2)
}
   0xa   :  { %s431_s29 = scalar_lea.vmem %s31_s19, 1024  ;;  %p436_p4 = scmp.lt.s32.totalorder %s31_s19, %s31_s19 }
   0xb   :  { %p432_p3 = scmp.ne.s32.totalorder %s31_s19, %s431_s29  ;;  %p437_p5 = scmp.lt.s32.totalorder %s431_s29, %s431_s29 }
   0xd   :  { %p438_p6 = por %p437_p5, %p436_p4 }
   0xf   :  { %p439_p7 = pnand %p438_p6, %p432_p3 }
  0x11   :  { %442 = shalt.err (!%p439_p7)
}
  0x12   :  { %s517_s30 = smov 128   ;;  %s518_s6 = smov 8  }
  0x13   :  { %36 = dma.hbm_to_vmem [thread:$0]  %s627_s1, 1024, %s31_s19, [#allocation6], %s517_s30, %s517_s30, %s518_s6  }
  0x14   :  { %s443_s11 = scalar_lea.hbm %s626_s0, 256 }
  0x15   :  { %p444_p8 = scmp.ne.s32.totalorder %s626_s0, %s443_s11  ;;  %p447_p9 = scmp.lt.u32.totalorder %s443_s11, %s626_s0 }
  0x17   :  { %p449_p10 = pnand %p447_p9, %p444_p8 }
  0x19   :  { %452 = shalt.err (!%p449_p10)
}
  0x1a   :  { %s453_s16 = scalar_lea.vmem %s551_s21, 256  ;;  %p458_p12 = scmp.lt.s32.totalorder %s551_s21, %s551_s21 }
  0x1b   :  { %p454_p11 = scmp.ne.s32.totalorder %s551_s21, %s453_s16  ;;  %p459_p13 = scmp.lt.s32.totalorder %s453_s16, %s453_s16 }
  0x1d   :  { %p460_p0 = por %p459_p13, %p458_p12 }
  0x1f   :  { %p461_p1 = pnand %p460_p0, %p454_p11 }
  0x21   :  { %464 = shalt.err (!%p461_p1)
}
  0x22   :  { %24 = dma.hbm_to_vmem [thread:$0]  %s626_s0, 256, %s551_s21, [#allocation3], %s517_s30, %s517_s30, %s518_s6  }
  0x23   :  { %s519_s18 = smov [#allocation7]   ;;  %s465_s23 = scalar_lea.hbm %s629_s3, 2048 }
  0x24   :  { %s44_s19 = sshll.u32 %s519_s18, 4  ;;  %p466_p2 = scmp.ne.s32.totalorder %s629_s3, %s465_s23  ;;  %s45_s19 = int_to_ptr.vmem [resolvable:$true] %s44_s19 }
  0x25   :  { %p469_p3 = scmp.lt.u32.totalorder %s465_s23, %s629_s3 }
  0x27   :  { %p471_p4 = pnand %p469_p3, %p466_p2 }
  0x29   :  { %474 = shalt.err (!%p471_p4)
}
  0x2a   :  { %s475_s28 = scalar_lea.vmem %s45_s19, 2048  ;;  %p480_p6 = scmp.lt.s32.totalorder %s45_s19, %s45_s19 }
  0x2b   :  { %p476_p5 = scmp.ne.s32.totalorder %s45_s19, %s475_s28  ;;  %p481_p7 = scmp.lt.s32.totalorder %s475_s28, %s475_s28 }
  0x2d   :  { %p482_p8 = por %p481_p7, %p480_p6 }
  0x2f   :  { %p483_p9 = pnand %p482_p8, %p476_p5 }
  0x31   :  { %486 = shalt.err (!%p483_p9)
}
  0x32   :  { %50 = dma.hbm_to_vmem [thread:$0]  %s629_s3, 2048, %s45_s19, [#allocation6], %s517_s30, %s517_s30, %s518_s6  }
  0x33   :  { %509 = dma.done.wait [#allocation3], 256  }
  0x34   :  { %510 = vsyncadd [#allocation3], 4294967040 }
  0x35   :  { %511 = dma.done.wait [#allocation6], 3072  }
  0x36   :  { %512 = vsyncadd [#allocation6], 4294964224  ;;  %v64_v0 = vld [vmem:[#allocation5] sm:$0xff]  ;;  %v65_v1 = vld [vmem:[#allocation5 + $0x8] sm:$0xff]  ;;  %vm79_vm0 = vcmask 523264   ;;  %s520_s9 = smov [#allocation8]  }
  0x37   :  { %v66_v2 = vld [vmem:[#allocation5 + $0x10] sm:$0xff]  ;;  %v367_v3 = vpack.c.bf16 %v65_v1, %v64_v0  ;;  %v67_v4 = vld [vmem:[#allocation5 + $0x18] sm:$0xff]  ;;  %v68_v6 = vld [vmem:[#allocation5 + $0x20] sm:$0xff]  ;;  %s268_s10 = sshll.u32 %s520_s9, 4  ;;  %s269_s10 = int_to_ptr.vmem [resolvable:$true] %s268_s10 }
  0x38   :  { %v371_v5 = vpack.c.bf16 %v67_v4, %v66_v2  ;;  %v69_v7 = vld [vmem:[#allocation5 + $0x28] sm:$0xff]  ;;  %v62_v8 = vld [vmem:[#allocation2] sm:$0xff]  ;;  %v163_v9 = vld [vmem:[#allocation7] sm:$0xff]  ;;  %p492_p11 = scmp.lt.s32.totalorder %s269_s10, %s269_s10 }
  0x39   :  { %368 = vmatprep.subr.bf16.mxu0 %v367_v3  ;;  %329 = vmatprep.mubr.msk.f32.mxu0 %vm79_vm0, %v62_v8  ;;  %v164_v10 = vld [vmem:[#allocation7 + $0x8] sm:$0xff]  ;;  %v165_v12 = vld [vmem:[#allocation7 + $0x10] sm:$0xff]  ;;  %v166_v13 = vld [vmem:[#allocation7 + $0x18] sm:$0xff]  ;;  %v375_v14 = vpack.c.bf16 %v69_v7, %v68_v6 }
  0x3a   :  { %370 = vmatpush3.bf16.msra.mxu0 %v367_v3  ;;  %v383_v11 = vpack.c.bf16 %v164_v10, %v163_v9  ;;  %v387_v15 = vpack.c.bf16 %v166_v13, %v165_v12  ;;  %v167_v16 = vld [vmem:[#allocation7 + $0x20] sm:$0xff]  ;;  %v168_v17 = vld [vmem:[#allocation7 + $0x28] sm:$0xff]  ;;  %v70_v18 = vld [vmem:[#allocation5 + $0x30] sm:$0xff] }
  0x3b   :  { %372 = vmatprep.subr.bf16.mxu0 %v371_v5  ;;  %v71_v19 = vld [vmem:[#allocation5 + $0x38] sm:$0xff]  ;;  %v391_v20 = vpack.c.bf16 %v168_v17, %v167_v16  ;;  %v169_v22 = vld [vmem:[#allocation7 + $0x30] sm:$0xff]  ;;  %v171_v25 = vld [vmem:[#allocation7 + $0x40] sm:$0xff] }
  0x3c   :  { %384 = vmatprep.subr.bf16.mxu1 %v383_v11  ;;  %v379_v21 = vpack.c.bf16 %v71_v19, %v70_v18  ;;  %v170_v23 = vld [vmem:[#allocation7 + $0x38] sm:$0xff]  ;;  %v172_v26 = vld [vmem:[#allocation7 + $0x48] sm:$0xff]  ;;  %v173_v29 = vld [vmem:[#allocation7 + $0x50] sm:$0xff] }
  0x3d   :  { %386 = vmatpush3.bf16.msra.mxu1 %v383_v11  ;;  %v395_v24 = vpack.c.bf16 %v170_v23, %v169_v22  ;;  %v63_v27 = vld [vmem:[#allocation2 + $0x8] sm:$0xff]  ;;  %v399_v28 = vpack.c.bf16 %v172_v26, %v171_v25  ;;  %v175_v32 = vld [vmem:[#allocation7 + $0x60] sm:$0xff]  ;;  %v176_v33 = vld [vmem:[#allocation7 + $0x68] sm:$0xff] }
  0x3e   :  { %374 = vmatpush3.bf16.msra.mxu0 %v371_v5  ;;  %388 = vmatprep.subr.bf16.mxu1 %v387_v15  ;;  %v174_v30 = vld [vmem:[#allocation7 + $0x58] sm:$0xff]  ;;  %v407_v34 = vpack.c.bf16 %v176_v33, %v175_v32  ;;  %v177_v35 = vld [vmem:[#allocation7 + $0x70] sm:$0xff] }
  0x3f   :  { %376 = vmatprep.subr.bf16.mxu0 %v375_v14  ;;  %v403_v31 = vpack.c.bf16 %v174_v30, %v173_v29  ;;  %v178_v36 = vld [vmem:[#allocation7 + $0x78] sm:$0xff]  ;;  %v281_v38 = vld [vmem:[%s628_s2] ss:$0 sm:$0xff]  ;;  %s487_s2 = scalar_lea.vmem %s269_s10, 256 }
  0x40   :  { %v411_v37 = vpack.c.bf16 %v178_v36, %v177_v35  ;;  %v284_v45 = vld [vmem:[%s630_s4] ss:$0 sm:$0xff]  ;;  %p488_p10 = scmp.ne.s32.totalorder %s269_s10, %s487_s2  ;;  %p493_p12 = scmp.lt.s32.totalorder %s487_s2, %s487_s2 }
  0x41   :  { %390 = vmatpush3.bf16.msra.mxu1 %v387_v15 }
  0x42   :  { %378 = vmatpush3.bf16.msra.mxu0 %v375_v14  ;;  %392 = vmatprep.subr.bf16.mxu1 %v391_v20  ;;  %p494_p13 = por %p493_p12, %p492_p11 }
  0x43   :  { %380 = vmatprep.subr.bf16.mxu0 %v379_v21 }
  0x44   :  { %p495_p0 = pnand %p494_p13, %p488_p10 }
  0x45   :  { %394 = vmatpush3.bf16.msra.mxu1 %v391_v20 }
  0x46   :  { %382 = vmatpush3.bf16.msra.mxu0 %v379_v21  ;;  %396 = vmatprep.subr.bf16.mxu1 %v395_v24 }
  0x49   :  { %330 = vmatmul.mubr.msk.f32.vlgmr.msra.gmra.mrb[0].mxu0 %vm79_vm0, %v63_v27  ;;  %398 = vmatpush3.bf16.msra.mxu1 %v395_v24 }
  0x4a   :  { %400 = vmatprep.subr.bf16.mxu1 %v399_v28 }
  0x4d   :  { %402 = vmatpush3.bf16.msra.mxu1 %v399_v28 }
  0x4e   :  { %404 = vmatprep.subr.bf16.mxu1 %v403_v31 }
  0x51   :  { %406 = vmatpush3.bf16.msra.mxu1 %v403_v31 }
  0x52   :  { %408 = vmatprep.subr.bf16.mxu1 %v407_v34 }
  0x55   :  { %410 = vmatpush3.bf16.msra.mxu1 %v407_v34 }
  0x56   :  { %412 = vmatprep.subr.bf16.mxu1 %v411_v37 }
  0x59   :  { %414 = vmatpush3.bf16.msra.mxu1 %v411_v37 }
 0x11c   :  { %v331_v39 = vpop.f32.mrb[0].mxu0 }
 0x11d   :  { %v158_v40 = vadd.f32 %v331_v39, %v281_v38  ;;  %v152_v41 = vpop.f32.mrb[1].mxu0 }
 0x11e   :  { %v153_v42 = vadd.f32 %v281_v38, %v152_v41 }
 0x11f   :  { %v162_v44 = vmax.f32 %v158_v40, 0.0 }
 0x120   :  { %v161_v43 = vmax.f32 %v153_v42, 0.0 }
 0x122   :  { %364 = vmatprep.mubr.f32.mxu1 %v161_v43 }
 0x123   :  { %365 = vmatmul.mubr.f32.vlgmr.msra.gmra.mrb[0].mxu1 %v162_v44 }
 0x1f6   :  { %v366_v46 = vpop.f32.mrb[0].mxu1 }
 0x1f7   :  { %v258_v47 = vadd.f32 %v366_v46, %v284_v45  ;;  %v252_v48 = vpop.f32.mrb[1].mxu1 }
 0x1f8   :  { %v253_v49 = vadd.f32 %v284_v45, %v252_v48 }
 0x1f9   :  { %262 = vst [vmem:[#allocation8 + $0x8] sm:$0xff] %v258_v47 }
 0x1fa   :  { %261 = vst [vmem:[#allocation8] sm:$0xff] %v253_v49 }
 0x1fb   :  { %498 = shalt.err (!%p495_p0)
}
 0x1fc   :  { %s499_s4 = scalar_lea.hbm %s631_s5, 256 }
 0x1fd   :  { %p500_p1 = scmp.ne.s32.totalorder %s631_s5, %s499_s4  ;;  %p503_p2 = scmp.lt.u32.totalorder %s499_s4, %s631_s5 }
 0x1ff   :  { %p505_p3 = pnand %p503_p2, %p500_p1 }
 0x201   :  { %508 = shalt.err (!%p505_p3)
}
 0x202   :  { %274 = dma.vmem_to_hbm [thread:$0]  %s269_s10, 256, %s631_s5, [#allocation4], %s517_s30, %s517_s30, %s518_s6  }
 0x203   :  { %513 = dma.done.wait [#allocation4], 256  }
 0x204   :  { %514 = vsyncadd [#allocation4], 4294967040 }
 0x205   :  { %278 = vsyncpa [#allocation3], 1 }
 0x206   :  { %279 = vsyncpa [#allocation6], 1 }
 0x207   :  { %280 = vsyncpa [#allocation4], 1 }

</bundles_post_ra>
